<compile_context>
chip_gen: v7x
topology: tpu7x:2x2x1
jax: 0.10.0
libtpu: 0.0.40
codegen_flags: <defaults>
</compile_context>

<pallas_src>
import functools

import jax
import jax.numpy as jnp
from jax.experimental import pallas as pl
from jax.experimental.pallas import tpu as pltpu


def _round_up(n, m):
    return ((n + m - 1) // m) * m


def _pick_tile(total, target, align):
    """Largest multiple of `align` that divides `total` and is <= ~target."""
    target = max(align, (target // align) * align)
    t = min(total, target)
    while total % t != 0:
        t -= align
    return t


# Physical VMEM capacity (used to derive a safe scoped-VMEM budget). v7x has
# only 64 MiB per TensorCore, so we must not assume the 128 MiB of v5e/v6e.
try:
    _VMEM_CAP = int(pltpu.get_tpu_info().vmem_capacity_bytes)
except Exception:  # conservative fallback, valid on every generation
    _VMEM_CAP = 64 * 1024 * 1024


def _mlp_kernel(x_ref, w1_ref, b1_ref, w2_ref, b2_ref, o_ref, acc_ref, *,
                precision):
    """One (batch tile, out tile) block; hidden dim reduced over grid axis 2."""
    k = pl.program_id(2)

    @pl.when(k == 0)
    def _():
        acc_ref[...] = jnp.zeros_like(acc_ref)

    # fc1 chunk: (tb, in_p) @ (in_p, th) -> f32; bias + ReLU in f32.
    h = jnp.dot(x_ref[...], w1_ref[...],
                preferred_element_type=jnp.float32, precision=precision)
    h = jnp.maximum(h + b1_ref[...], 0.0)

    # fc2 partial: (tb, th) @ (th, tn), accumulated in the f32 scratch.
    acc_ref[...] += jnp.dot(h.astype(w2_ref.dtype), w2_ref[...],
                            preferred_element_type=jnp.float32,
                            precision=precision)

    @pl.when(k == pl.num_programs(2) - 1)
    def _():
        o_ref[...] = (acc_ref[...] + b2_ref[...]).astype(o_ref.dtype)


def prepare_mlp_params(w1, b1, w2, b2, *, compute_dtype=jnp.bfloat16):
    """One-time pad + cast of the weights (hoisted out of the forward pass).

    w1: (input_dim, hidden_dim), b1: (hidden_dim,)
    w2: (hidden_dim, output_dim), b2: (output_dim,)
    """
    in_dim, hid_dim = w1.shape
    out_dim = w2.shape[1]
    # 256-aligned tiles keep the 2x256x256 bf16 MXU (v6e/v7x) full; 128 for f32.
    align = 256 if jnp.dtype(compute_dtype) == jnp.dtype(jnp.bfloat16) else 128
    in_p = _round_up(in_dim, align)
    hid_p = _round_up(hid_dim, align)
    out_p = _round_up(out_dim, align)

    w1p = jnp.zeros((in_p, hid_p), compute_dtype).at[:in_dim, :hid_dim].set(
        w1.astype(compute_dtype))
    w2p = jnp.zeros((hid_p, out_p), compute_dtype).at[:hid_dim, :out_dim].set(
        w2.astype(compute_dtype))
    # Biases stay f32 (epilogue math is f32); shaped (1, N) for broadcast.
    b1p = jnp.zeros((1, hid_p), jnp.float32).at[0, :hid_dim].set(
        b1.astype(jnp.float32))
    b2p = jnp.zeros((1, out_p), jnp.float32).at[0, :out_dim].set(
        b2.astype(jnp.float32))

    return {"w1": w1p, "b1": b1p, "w2": w2p, "b2": b2p,
            "dims": (in_dim, hid_dim, out_dim),
            "align": align, "compute_dtype": compute_dtype}


def mlp_apply(x, params, *, block_batch=512, block_hidden=512, block_out=512):
    """Fused MLP forward using pre-padded params from prepare_mlp_params."""
    batch, in_dim = x.shape
    p_in, _, out_dim = params["dims"]
    assert in_dim == p_in, "x feature dim does not match prepared params"
    align = params["align"]
    compute_dtype = params["compute_dtype"]
    w1p, b1p, w2p, b2p = params["w1"], params["b1"], params["w2"], params["b2"]
    in_p, hid_p = w1p.shape
    out_p = w2p.shape[1]
    out_dtype = x.dtype

    # ---- tile selection ------------------------------------------------------
    th = _pick_tile(hid_p, block_hidden, align)
    tn = _pick_tile(out_p, block_out, align)

    batch8 = _round_up(batch, 8)
    tb = max(8, min((block_batch // 8) * 8, batch8))
    # v7x has 2 TensorCores: prefer >=2 "parallel" batch steps when possible.
    if batch8 // tb < 2 and batch8 >= 16:
        tb = _round_up(batch8 // 2, 8)

    # ---- VMEM budget (generation-aware) and tile shrink ---------------------
    cbytes = jnp.dtype(compute_dtype).itemsize
    obytes = jnp.dtype(out_dtype).itemsize
    budget = min((_VMEM_CAP * 3) // 4, 100 * 1024 * 1024)

    def est(tb_, th_, tn_):
        e = 2 * (tb_ * in_p + in_p * th_ + th_ * tn_) * cbytes  # double-buffered
        e += 2 * 8 * (th_ + tn_) * 4                            # biases (padded)
        e += 2 * tb_ * tn_ * obytes                             # output tile
        e += tb_ * tn_ * 4 + tb_ * th_ * 4                      # acc + fc1 interm.
        return e

    while est(tb, th, tn) > budget and tb > 8:
        tb = max(8, ((tb // 2) // 8) * 8)
    while est(tb, th, tn) > budget and th > align:
        th = _pick_tile(hid_p, th // 2, align)
    while est(tb, th, tn) > budget and tn > align:
        tn = _pick_tile(out_p, tn // 2, align)

    batch_p = _round_up(batch, tb)

    # ---- pad / cast x only when actually needed ------------------------------
    if batch_p == batch and in_p == in_dim and x.dtype == compute_dtype:
        xp = x
    else:
        xp = jnp.zeros((batch_p, in_p), compute_dtype).at[:batch, :in_dim].set(
            x.astype(compute_dtype))

    grid = (batch_p // tb, out_p // tn, hid_p // th)
    precision = (jax.lax.Precision.HIGHEST
                 if jnp.dtype(compute_dtype) == jnp.dtype(jnp.float32) else None)
    vmem_limit = int(min(budget, max(32 * 1024 * 1024, 2 * est(tb, th, tn))))

    # NOTE: when out_p // tn > 1, the fc1 chunk is recomputed per output tile
    # (standard fusion tradeoff); for typical MLP output dims there is 1 step.
    out_padded = pl.pallas_call(
        functools.partial(_mlp_kernel, precision=precision),
        out_shape=jax.ShapeDtypeStruct((batch_p, out_p), out_dtype),
        grid_spec=pltpu.PrefetchScalarGridSpec(
            num_scalar_prefetch=0,
            grid=grid,
            in_specs=[
                # x: tiled along batch, revisited across out/hidden steps.
                pl.BlockSpec((tb, in_p), lambda i, j, k: (i, 0)),
                # w1: tiled along hidden (columns).
                pl.BlockSpec((in_p, th), lambda i, j, k: (0, k)),
                pl.BlockSpec((1, th), lambda i, j, k: (0, k)),
                # w2: tiled along hidden (rows) and output (columns).
                pl.BlockSpec((th, tn), lambda i, j, k: (k, j)),
                pl.BlockSpec((1, tn), lambda i, j, k: (0, j)),
            ],
            out_specs=pl.BlockSpec((tb, tn), lambda i, j, k: (i, j)),
            scratch_shapes=[pltpu.VMEM((tb, tn), jnp.float32)],
        ),
        compiler_params=pltpu.CompilerParams(
            # batch/out are independent -> parallel (megacore); hidden reduces.
            dimension_semantics=("parallel", "parallel", "arbitrary"),
            vmem_limit_bytes=vmem_limit,
        ),
    )(xp, w1p, b1p, w2p, b2p)

    if batch_p == batch and out_p == out_dim:
        return out_padded
    return out_padded[:batch, :out_dim]


def mlp_forward(x, w1, b1, w2, b2, *, compute_dtype=jnp.bfloat16, **tile_kwargs):
    """Convenience wrapper (pads weights every call; prefer prepare+apply)."""
    params = prepare_mlp_params(w1, b1, w2, b2, compute_dtype=compute_dtype)
    return mlp_apply(x, params, **tile_kwargs)


def init_mlp_params(key, input_dim, hidden_dim, output_dim, dtype=jnp.float32):
    """Deterministic init mimicking nn.Linear's U(-1/sqrt(fan_in), 1/sqrt(fan_in))."""
    k1, k2, k3, k4 = jax.random.split(key, 4)
    lim1 = 1.0 / jnp.sqrt(input_dim)
    lim2 = 1.0 / jnp.sqrt(hidden_dim)
    # Stored as (in_features, out_features) for the kernel (see layout comment).
    w1 = jax.random.uniform(k1, (input_dim, hidden_dim), dtype, -lim1, lim1)
    b1 = jax.random.uniform(k2, (hidden_dim,), dtype, -lim1, lim1)
    w2 = jax.random.uniform(k3, (hidden_dim, output_dim), dtype, -lim2, lim2)
    b2 = jax.random.uniform(k4, (output_dim,), dtype, -lim2, lim2)
    return w1, b1, w2, b2


def mlp_reference(x, w1, b1, w2, b2):
    hp = jax.lax.Precision.HIGHEST
    h = jnp.maximum(jnp.dot(x, w1, precision=hp) + b1, 0.0)
    return jnp.dot(h, w2, precision=hp) + b2


if __name__ == "__main__":
    # --- small demo matching the module's forward ---------------------------
    batch, input_dim, hidden_dim, output_dim = 8, 32, 64, 16
    key = jax.random.PRNGKey(0)
    kx, kp = jax.random.split(key)
    x = jax.random.normal(kx, (batch, input_dim), jnp.float32)
    w1, b1, w2, b2 = init_mlp_params(kp, input_dim, hidden_dim, output_dim)
    ref = mlp_reference(x, w1, b1, w2, b2)

    # f32 exact-parity path (precision=HIGHEST inside the kernel).
    params_f32 = prepare_mlp_params(w1, b1, w2, b2, compute_dtype=jnp.float32)
    out_f32 = jax.block_until_ready(mlp_apply(x, params_f32))
    assert out_f32.shape == (batch, output_dim)
    assert jnp.allclose(out_f32, ref, atol=1e-5, rtol=1e-5)

    # bf16-matmul / f32-accumulate perf default.
    params_bf16 = prepare_mlp_params(w1, b1, w2, b2)  # bf16 by default
    out_bf16 = jax.block_until_ready(mlp_apply(x, params_bf16))
    assert out_bf16.shape == (batch, output_dim)
    assert jnp.allclose(out_bf16, ref, atol=5e-2, rtol=5e-2)

    # --- still-small case exercising multi-step batch/hidden tiling + padding
    batch2, in2, hid2, out2 = 40, 160, 600, 72
    kx2, kp2 = jax.random.split(jax.random.PRNGKey(1))
    x2 = jax.random.normal(kx2, (batch2, in2), jnp.float32)
    p2 = init_mlp_params(kp2, in2, hid2, out2)
    ref2 = mlp_reference(x2, *p2)

    prm2_f32 = prepare_mlp_params(*p2, compute_dtype=jnp.float32)
    o2_f32 = jax.block_until_ready(
        mlp_apply(x2, prm2_f32, block_batch=16, block_hidden=256))
    assert o2_f32.shape == (batch2, out2)
    assert jnp.allclose(o2_f32, ref2, atol=1e-4, rtol=1e-4)

    prm2_bf16 = prepare_mlp_params(*p2)
    o2_bf16 = jax.block_until_ready(
        mlp_apply(x2, prm2_bf16, block_batch=16, block_hidden=256))
    assert o2_bf16.shape == (batch2, out2)
    assert jnp.allclose(o2_bf16, ref2, atol=5e-2, rtol=5e-2)

    print("KERNEL_OK")
</pallas_src>

<mosaic_0001>
module attributes {stable_mosaic.version = 11 : i64} {
  func.func @_mlp_kernel(%arg0: i32, %arg1: i32, %arg2: i32, %arg3: memref<8x128xf32, #tpu.memory_space<vmem>>, %arg4: memref<128x128xf32, #tpu.memory_space<vmem>>, %arg5: memref<1x128xf32, #tpu.memory_space<vmem>>, %arg6: memref<128x128xf32, #tpu.memory_space<vmem>>, %arg7: memref<1x128xf32, #tpu.memory_space<vmem>>, %arg8: memref<8x128xf32, #tpu.memory_space<vmem>>, %arg9: memref<8x128xf32, #tpu.memory_space<vmem>>) attributes {dimension_semantics = [#tpu.dimension_semantics<parallel>, #tpu.dimension_semantics<parallel>, #tpu.dimension_semantics<arbitrary>], iteration_bounds = array<i64: 1, 1, 1>, scalar_prefetch = 0 : i64, scratch_operands = 1 : i64, tpu.core_type = #tpu.core_type<tc>, window_params = [{transform_indices = @transform_0, window_bounds = array<i64: 8, 128>}, {transform_indices = @transform_1, window_bounds = array<i64: 128, 128>}, {transform_indices = @transform_2, window_bounds = array<i64: 1, 128>}, {transform_indices = @transform_3, window_bounds = array<i64: 128, 128>}, {transform_indices = @transform_4, window_bounds = array<i64: 1, 128>}, {transform_indices = @transform_5, window_bounds = array<i64: 8, 128>}]} {
    %c0_i32 = arith.constant 0 : i32
    %0 = arith.cmpi eq, %arg2, %c0_i32 : i32
    %1 = arith.extui %0 : i1 to i32
    %c0_i32_0 = arith.constant 0 : i32
    %2 = arith.cmpi ne, %1, %c0_i32_0 : i32
    scf.if %2 {
      %cst_16 = arith.constant 0.000000e+00 : f32
      %19 = vector.broadcast %cst_16 : f32 to vector<8x128xf32>
      %c0_17 = arith.constant 0 : index
      %c0_18 = arith.constant 0 : index
      %20 = vector.load %arg9[%c0_17, %c0_18] : memref<8x128xf32, #tpu.memory_space<vmem>>, vector<8x128xf32>
      tpu.vector_store %arg9[%c0_17, %c0_18], %19 {strides = array<i32>} : memref<8x128xf32, #tpu.memory_space<vmem>>, vector<8x128xf32>,
    } else {
    }
    %c0 = arith.constant 0 : index
    %c0_1 = arith.constant 0 : index
    %3 = vector.load %arg3[%c0, %c0_1] : memref<8x128xf32, #tpu.memory_space<vmem>>, vector<8x128xf32>
    %c0_2 = arith.constant 0 : index
    %c0_3 = arith.constant 0 : index
    %4 = vector.load %arg4[%c0_2, %c0_3] : memref<128x128xf32, #tpu.memory_space<vmem>>, vector<128x128xf32>
    %cst = arith.constant dense<0.000000e+00> : vector<8x128xf32>
    %5 = tpu.matmul %3, %4, %cst {dimension_numbers = #tpu.dot_dimension_numbers<[1], [0], [0], [1], [0, 0, 1, 1], [], []>, precision = #tpu.contract_precision<fp32>} : vector<8x128xf32>, vector<128x128xf32>, vector<8x128xf32> -> vector<8x128xf32>
    %c0_4 = arith.constant 0 : index
    %c0_5 = arith.constant 0 : index
    %6 = vector.load %arg5[%c0_4, %c0_5] : memref<1x128xf32, #tpu.memory_space<vmem>>, vector<1x128xf32>
    %7 = vector.broadcast %6 : vector<1x128xf32> to vector<8x128xf32>
    %8 = arith.addf %5, %7 : vector<8x128xf32>
    %cst_6 = arith.constant 0.000000e+00 : f32
    %9 = vector.broadcast %cst_6 : f32 to vector<8x128xf32>
    %10 = arith.maximumf %8, %9 : vector<8x128xf32>
    %c0_7 = arith.constant 0 : index
    %c0_8 = arith.constant 0 : index
    %11 = vector.load %arg9[%c0_7, %c0_8] : memref<8x128xf32, #tpu.memory_space<vmem>>, vector<8x128xf32>
    %c0_9 = arith.constant 0 : index
    %c0_10 = arith.constant 0 : index
    %12 = vector.load %arg6[%c0_9, %c0_10] : memref<128x128xf32, #tpu.memory_space<vmem>>, vector<128x128xf32>
    %cst_11 = arith.constant dense<0.000000e+00> : vector<8x128xf32>
    %13 = tpu.matmul %10, %12, %cst_11 {dimension_numbers = #tpu.dot_dimension_numbers<[1], [0], [0], [1], [0, 0, 1, 1], [], []>, precision = #tpu.contract_precision<fp32>} : vector<8x128xf32>, vector<128x128xf32>, vector<8x128xf32> -> vector<8x128xf32>
    %14 = arith.addf %11, %13 : vector<8x128xf32>
    %c0_12 = arith.constant 0 : index
    %c0_13 = arith.constant 0 : index
    %15 = vector.load %arg9[%c0_12, %c0_13] : memref<8x128xf32, #tpu.memory_space<vmem>>, vector<8x128xf32>
    tpu.vector_store %arg9[%c0_12, %c0_13], %14 {strides = array<i32>} : memref<8x128xf32, #tpu.memory_space<vmem>>, vector<8x128xf32>,
    %c0_i32_14 = arith.constant 0 : i32
    %16 = arith.cmpi eq, %arg2, %c0_i32_14 : i32
    %17 = arith.extui %16 : i1 to i32
    %c0_i32_15 = arith.constant 0 : i32
    %18 = arith.cmpi ne, %17, %c0_i32_15 : i32
    scf.if %18 {
      %c0_16 = arith.constant 0 : index
      %c0_17 = arith.constant 0 : index
      %19 = vector.load %arg9[%c0_16, %c0_17] : memref<8x128xf32, #tpu.memory_space<vmem>>, vector<8x128xf32>
      %c0_18 = arith.constant 0 : index
      %c0_19 = arith.constant 0 : index
      %20 = vector.load %arg7[%c0_18, %c0_19] : memref<1x128xf32, #tpu.memory_space<vmem>>, vector<1x128xf32>
      %21 = vector.broadcast %20 : vector<1x128xf32> to vector<8x128xf32>
      %22 = arith.addf %19, %21 : vector<8x128xf32>
      %c0_20 = arith.constant 0 : index
      %c0_21 = arith.constant 0 : index
      %23 = vector.load %arg8[%c0_20, %c0_21] : memref<8x128xf32, #tpu.memory_space<vmem>>, vector<8x128xf32>
      tpu.vector_store %arg8[%c0_20, %c0_21], %22 {strides = array<i32>} : memref<8x128xf32, #tpu.memory_space<vmem>>, vector<8x128xf32>,
    } else {
    }
    return
  }
  func.func @transform_0(%arg0: i32, %arg1: i32, %arg2: i32) -> (i32, i32) {
    %c0_i32 = arith.constant 0 : i32
    %c0_i32_0 = arith.constant 0 : i32
    return %arg0, %c0_i32 : i32, i32
  }
  func.func @transform_1(%arg0: i32, %arg1: i32, %arg2: i32) -> (i32, i32) {
    %c0_i32 = arith.constant 0 : i32
    %c0_i32_0 = arith.constant 0 : i32
    return %c0_i32, %arg2 : i32, i32
  }
  func.func @transform_2(%arg0: i32, %arg1: i32, %arg2: i32) -> (i32, i32) {
    %c0_i32 = arith.constant 0 : i32
    %c0_i32_0 = arith.constant 0 : i32
    return %c0_i32, %arg2 : i32, i32
  }
  func.func @transform_3(%arg0: i32, %arg1: i32, %arg2: i32) -> (i32, i32) {
    %c0_i32 = arith.constant 0 : i32
    return %arg2, %arg1 : i32, i32
  }
  func.func @transform_4(%arg0: i32, %arg1: i32, %arg2: i32) -> (i32, i32) {
    %c0_i32 = arith.constant 0 : i32
    %c0_i32_0 = arith.constant 0 : i32
    return %c0_i32, %arg1 : i32, i32
  }
  func.func @transform_5(%arg0: i32, %arg1: i32, %arg2: i32) -> (i32, i32) {
    %c0_i32 = arith.constant 0 : i32
    return %arg0, %arg1 : i32, i32
  }
}

</mosaic_0001>

<bundles_post_ra>
// kernel: tpu_custom_call.1
= control target key start
LH: loop header
LB: loop body
LE: loop exit
PB: predicated region body
PF: predicated region fallthrough
CT: control target
= control target key end

     0   :  { %10 = vsyncpa [#allocation4], 0  ;;  %s3019_s0 = inlined_call_operand.hbm [shape: f32[8,128], index: 0, kind: input, shape index: {}]   ;;  %s3020_s1 = inlined_call_operand.hbm [shape: f32[128,128], index: 1, kind: input, shape index: {}]   ;;  %s3021_s2 = inlined_call_operand.vmem [shape: f32[1,128], index: 2, kind: input, shape index: {}]   ;;  %s3022_s3 = inlined_call_operand.hbm [shape: f32[128,128], index: 3, kind: input, shape index: {}]   ;;  %s3023_s4 = inlined_call_operand.vmem [shape: f32[1,128], index: 4, kind: input, shape index: {}]   ;;  %s3024_s5 = inlined_call_operand.hbm [shape: f32[8,128], index: 5, kind: output, shape index: {}]  }
   0x1   :  { %11 = vsyncpa [#allocation7], 0 }
   0x2   :  { %12 = vsyncpa [#allocation5], 0  ;;  %s2448_s18 = smov [#allocation6]   ;;  %s2354_s22 = scalar_lea.hbm %s3020_s1, 2048 }
   0x3   :  { %s28_s19 = sshll.u32 %s2448_s18, 4  ;;  %p2355_p0 = scmp.ne.s32.totalorder %s3020_s1, %s2354_s22  ;;  %s29_s19 = int_to_ptr.vmem [resolvable:$true] %s28_s19 }
   0x4   :  { %p2358_p1 = scmp.lt.u32.totalorder %s2354_s22, %s3020_s1 }
   0x6   :  { %p2360_p2 = pnand %p2358_p1, %p2355_p0 }
   0x8   :  { %2363 = shalt.err (!%p2360_p2)
}
   0x9   :  { %s2364_s27 = scalar_lea.vmem %s29_s19, 2048  ;;  %p2369_p4 = scmp.lt.s32.totalorder %s29_s19, %s29_s19 }
   0xa   :  { %p2365_p3 = scmp.ne.s32.totalorder %s29_s19, %s2364_s27  ;;  %p2370_p5 = scmp.lt.s32.totalorder %s2364_s27, %s2364_s27 }
   0xc   :  { %p2371_p6 = por %p2370_p5, %p2369_p4 }
   0xe   :  { %p2372_p7 = pnand %p2371_p6, %p2365_p3 }
  0x10   :  { %2375 = shalt.err (!%p2372_p7)
}
  0x11   :  { %s2449_s28 = smov 128   ;;  %s2450_s29 = smov 8  }
  0x12   :  { %34 = dma.hbm_to_vmem [thread:$0]  %s3020_s1, 2048, %s29_s19, [#allocation7], %s2449_s28, %s2449_s28, %s2450_s29  }
  0x13   :  { %s2451_s7 = smov [#allocation3]   ;;  %s2452_s9 = smov [#allocation8]  }
  0x14   :  { %s19_s8 = sshll.u32 %s2451_s7, 4  ;;  %s42_s10 = sshll.u32 %s2452_s9, 4  ;;  %s20_s8 = int_to_ptr.vmem [resolvable:$true] %s19_s8  ;;  %s43_s10 = int_to_ptr.vmem [resolvable:$true] %s42_s10 }
  0x15   :  { %s2376_s13 = scalar_lea.hbm %s3019_s0, 128 }
  0x16   :  { %p2377_p8 = scmp.ne.s32.totalorder %s3019_s0, %s2376_s13  ;;  %p2380_p9 = scmp.lt.u32.totalorder %s2376_s13, %s3019_s0 }
  0x18   :  { %p2382_p10 = pnand %p2380_p9, %p2377_p8 }
  0x1a   :  { %2385 = shalt.err (!%p2382_p10)
}
  0x1b   :  { %s2386_s1 = scalar_lea.vmem %s20_s8, 128  ;;  %p2391_p12 = scmp.lt.s32.totalorder %s20_s8, %s20_s8 }
  0x1c   :  { %p2387_p11 = scmp.ne.s32.totalorder %s20_s8, %s2386_s1  ;;  %p2392_p13 = scmp.lt.s32.totalorder %s2386_s1, %s2386_s1 }
  0x1e   :  { %p2393_p0 = por %p2392_p13, %p2391_p12 }
  0x20   :  { %p2394_p1 = pnand %p2393_p0, %p2387_p11 }
  0x22   :  { %2397 = shalt.err (!%p2394_p1)
}
  0x23   :  { %22 = dma.hbm_to_vmem [thread:$0]  %s3019_s0, 128, %s20_s8, [#allocation4]  }
  0x24   :  { %s2398_s22 = scalar_lea.hbm %s3022_s3, 2048 }
  0x25   :  { %p2399_p2 = scmp.ne.s32.totalorder %s3022_s3, %s2398_s22  ;;  %p2402_p3 = scmp.lt.u32.totalorder %s2398_s22, %s3022_s3 }
  0x27   :  { %p2404_p4 = pnand %p2402_p3, %p2399_p2 }
  0x29   :  { %2407 = shalt.err (!%p2404_p4)
}
  0x2a   :  { %s2408_s27 = scalar_lea.vmem %s43_s10, 2048  ;;  %p2413_p6 = scmp.lt.s32.totalorder %s43_s10, %s43_s10 }
  0x2b   :  { %p2409_p5 = scmp.ne.s32.totalorder %s43_s10, %s2408_s27  ;;  %p2414_p7 = scmp.lt.s32.totalorder %s2408_s27, %s2408_s27 }
  0x2d   :  { %p2415_p8 = por %p2414_p7, %p2413_p6 }
  0x2f   :  { %p2416_p9 = pnand %p2415_p8, %p2409_p5 }
  0x31   :  { %2419 = shalt.err (!%p2416_p9)
}
  0x32   :  { %48 = dma.hbm_to_vmem [thread:$0]  %s3022_s3, 2048, %s43_s10, [#allocation7], %s2449_s28, %s2449_s28, %s2450_s29  }
  0x33   :  { %2442 = dma.done.wait [#allocation4], 128  }
  0x34   :  { %2443 = vsyncadd [#allocation4], 4294967168 }
  0x35   :  { %2444 = dma.done.wait [#allocation7], 4096  }
  0x36   :  { %2445 = vsyncadd [#allocation7], 4294963200  ;;  %v2453_v0 = vmov 0.0|0.0   ;;  %vm2454_vm0 = vmmov 0   ;;  %v2455_v1 = vmov 0.0   ;;  %v66_v2 = vld [vmem:[#allocation6] sm:$0xff] }
  0x37   :  { %2046 = vmatprep.subr.bf16.mxu0 %v2453_v0  ;;  %1658 = vmatprep.mubr.msk.f32.mxu0 %vm2454_vm0, %v2455_v1  ;;  %v67_v3 = vld [vmem:[#allocation6 + $0x8] sm:$0xff]  ;;  %v68_v4 = vld [vmem:[#allocation6 + $0x10] sm:$0xff]  ;;  %v90_v5 = vand.u32 4294901760, %v66_v2  ;;  %v69_v7 = vld [vmem:[#allocation6 + $0x18] sm:$0xff]  ;;  %s2456_s6 = smov [#allocation9]  }
  0x38   :  { %2190 = vmatprep.subr.bf16.mxu1 %v2453_v0  ;;  %1868 = vmatprep.mubr.msk.f32.mxu1 %vm2454_vm0, %v2455_v1  ;;  %v93_v6 = vand.u32 4294901760, %v67_v3  ;;  %v96_v8 = vand.u32 4294901760, %v68_v4  ;;  %v99_v9 = vand.u32 4294901760, %v69_v7  ;;  %v70_v10 = vld [vmem:[#allocation6 + $0x20] sm:$0xff]  ;;  %v71_v11 = vld [vmem:[#allocation6 + $0x28] sm:$0xff]  ;;  %v72_v16 = vld [vmem:[#allocation6 + $0x30] sm:$0xff] }
  0x39   :  { %v102_v14 = vand.u32 4294901760, %v70_v10  ;;  %v105_v15 = vand.u32 4294901760, %v71_v11  ;;  %v73_v17 = vld [vmem:[#allocation6 + $0x38] sm:$0xff]  ;;  %v108_v19 = vand.u32 4294901760, %v72_v16  ;;  %v74_v21 = vld [vmem:[#allocation6 + $0x40] sm:$0xff]  ;;  %v75_v22 = vld [vmem:[#allocation6 + $0x48] sm:$0xff]  ;;  %v2545_v24 = vsub.f32 %v66_v2, %v90_v5 }
  0x3a   :  { %v2535_v12 = vpack.c.bf16 %v93_v6, %v90_v5  ;;  %v2538_v13 = vpack.c.bf16 %v99_v9, %v96_v8  ;;  %v111_v20 = vand.u32 4294901760, %v73_v17  ;;  %v65_v23 = vld [vmem:[#allocation3] sm:$0xff]  ;;  %v2547_v25 = vsub.f32 %v67_v3, %v93_v6  ;;  %v76_v29 = vld [vmem:[#allocation6 + $0x50] sm:$0xff]  ;;  %v78_v32 = vld [vmem:[#allocation6 + $0x60] sm:$0xff]  ;;  %s1410_s7 = sshll.u32 %s2456_s6, 4  ;;  %s1411_s7 = int_to_ptr.vmem [resolvable:$true] %s1410_s7 }
  0x3b   :  { %v2542_v18 = vpack.c.bf16 %v105_v15, %v102_v14  ;;  %v114_v27 = vand.u32 4294901760, %v74_v21  ;;  %v117_v28 = vand.u32 4294901760, %v75_v22  ;;  %v77_v30 = vld [vmem:[#allocation6 + $0x58] sm:$0xff]  ;;  %v2553_v31 = vand.u32 4294901760, %v65_v23  ;;  %v79_v35 = vld [vmem:[#allocation6 + $0x68] sm:$0xff]  ;;  %v80_v36 = vld [vmem:[#allocation6 + $0x70] sm:$0xff]  ;;  %p2425_p11 = scmp.lt.s32.totalorder %s1411_s7, %s1411_s7 }
  0x3c   :  { %2048 = vmatpush3.bf16.msra.mxu0 %v2535_v12  ;;  %v2550_v26 = vpack.c.bf16 %v111_v20, %v108_v19  ;;  %v2555_v33 = vsub.f32 %v68_v4, %v96_v8  ;;  %v120_v34 = vand.u32 4294901760, %v76_v29  ;;  %v81_v37 = vld [vmem:[#allocation6 + $0x78] sm:$0xff]  ;;  %v123_v39 = vand.u32 4294901760, %v77_v30  ;;  %s2420_s8 = scalar_lea.vmem %s1411_s7, 128 }
  0x3d   :  { %2049 = vmatprep.subr.bf16.mxu0 %v2453_v0  ;;  %v2558_v38 = vpack.c.bf16 %v117_v28, %v114_v27  ;;  %v183_v40 = vand.u32 4294901760, %v2545_v24  ;;  %v190_v41 = vand.u32 4294901760, %v2547_v25  ;;  %v2562_v42 = vsub.f32 %v69_v7, %v99_v9  ;;  %p2421_p10 = scmp.ne.s32.totalorder %s1411_s7, %s2420_s8  ;;  %p2426_p12 = scmp.lt.s32.totalorder %s2420_s8, %s2420_s8 }
  0x3e   :  { %v2564_v43 = vsub.f32 %v70_v10, %v102_v14  ;;  %v2566_v44 = vsub.f32 %v71_v11, %v105_v15  ;;  %v2570_v45 = vsub.f32 %v65_v23, %v2553_v31  ;;  %v126_v46 = vand.u32 4294901760, %v78_v32 }
  0x3f   :  { %v129_v47 = vand.u32 4294901760, %v79_v35  ;;  %v132_v48 = vand.u32 4294901760, %v80_v36  ;;  %v135_v49 = vand.u32 4294901760, %v81_v37  ;;  %v2572_v50 = vsub.f32 %v72_v16, %v108_v19  ;;  %p2427_p13 = por %p2426_p12, %p2425_p11 }
  0x40   :  { %2051 = vmatpush3.bf16.msra.mxu0 %v2538_v13  ;;  %v2574_v51 = vsub.f32 %v73_v17, %v111_v20  ;;  %v2576_v52 = vsub.f32 %v74_v21, %v114_v27  ;;  %v197_v53 = vand.u32 4294901760, %v2555_v33  ;;  %v2580_v54 = vsub.f32 %v75_v22, %v117_v28 }
  0x41   :  { %2052 = vmatprep.subr.bf16.mxu0 %v2453_v0  ;;  %v2582_v55 = vpack.c.bf16 %v123_v39, %v120_v34  ;;  %v184_v56 = vsub.f32 %v2545_v24, %v183_v40  ;;  %v191_v57 = vsub.f32 %v2547_v25, %v190_v41  ;;  %v2587_v58 = vsub.f32 %v76_v29, %v120_v34  ;;  %p2428_p0 = pnand %p2427_p13, %p2421_p10 }
  0x42   :  { %v2589_v59 = vsub.f32 %v77_v30, %v123_v39  ;;  %v2591_v60 = vsub.f32 %v78_v32, %v126_v46  ;;  %v172_v61 = vand.u32 4294901760, %v2570_v45  ;;  %v2594_v62 = vpack.c.bf16 %v129_v47, %v126_v46 }
  0x43   :  { %v2596_v63 = vsub.f32 %v79_v35, %v129_v47  ;;  %v2598_v2 = vpack.c.bf16 %v135_v49, %v132_v48  ;;  %v2600_v3 = vsub.f32 %v80_v36, %v132_v48  ;;  %v2602_v4 = vsub.f32 %v81_v37, %v135_v49 }
  0x44   :  { %2054 = vmatpush3.bf16.msra.mxu0 %v2542_v18  ;;  %v198_v5 = vsub.f32 %v2555_v33, %v197_v53  ;;  %v204_v6 = vand.u32 4294901760, %v2562_v42  ;;  %v211_v7 = vand.u32 4294901760, %v2564_v43  ;;  %v185_v8 = vand.u32 4294901760, %v184_v56 }
  0x45   :  { %2055 = vmatprep.subr.bf16.mxu0 %v2453_v0  ;;  %v192_v9 = vand.u32 4294901760, %v191_v57  ;;  %v218_v10 = vand.u32 4294901760, %v2566_v44  ;;  %v225_v11 = vand.u32 4294901760, %v2572_v50  ;;  %v173_v14 = vsub.f32 %v2570_v45, %v172_v61 }
  0x46   :  { %v232_v15 = vand.u32 4294901760, %v2574_v51  ;;  %v239_v16 = vand.u32 4294901760, %v2576_v52  ;;  %v246_v17 = vand.u32 4294901760, %v2580_v54  ;;  %v253_v19 = vand.u32 4294901760, %v2587_v58 }
  0x47   :  { %v260_v20 = vand.u32 4294901760, %v2589_v59  ;;  %v267_v21 = vand.u32 4294901760, %v2591_v60  ;;  %v274_v22 = vand.u32 4294901760, %v2596_v63  ;;  %v281_v23 = vand.u32 4294901760, %v2600_v3 }
  0x48   :  { %2057 = vmatpush3.bf16.msra.mxu0 %v2550_v26  ;;  %v288_v27 = vand.u32 4294901760, %v2602_v4  ;;  %v2623_v28 = vpack.c.bf16 %v190_v41, %v183_v40  ;;  %v2625_v29 = vpack.c.bf16 %v204_v6, %v197_v53  ;;  %v205_v30 = vsub.f32 %v2562_v42, %v204_v6 }
  0x49   :  { %2058 = vmatprep.subr.bf16.mxu0 %v2453_v0  ;;  %v2629_v32 = vpack.c.bf16 %v218_v10, %v211_v7  ;;  %v2631_v34 = vpack.c.bf16 %v232_v15, %v225_v11  ;;  %v2633_v35 = vpack.c.bf16 %v246_v17, %v239_v16  ;;  %v2636_v36 = vpack.c.bf16 %v260_v20, %v253_v19 }
  0x4a   :  { %v2638_v37 = vpack.c.bf16 %v274_v22, %v267_v21  ;;  %v2640_v39 = vpack.c.bf16 %v288_v27, %v281_v23  ;;  %v174_v40 = vand.u32 4294901760, %v173_v14  ;;  %v199_v41 = vand.u32 4294901760, %v198_v5 }
  0x4b   :  { %v2071_v46 = vpack.c.bf16 %v192_v9, %v185_v8  ;;  %v206_v47 = vand.u32 4294901760, %v205_v30  ;;  %v212_v48 = vsub.f32 %v2564_v43, %v211_v7  ;;  %v219_v49 = vsub.f32 %v2566_v44, %v218_v10 }
  0x4c   :  { %2060 = vmatpush3.bf16.msra.mxu0 %v2558_v38  ;;  %v226_v53 = vsub.f32 %v2572_v50, %v225_v11  ;;  %v233_v14 = vsub.f32 %v2574_v51, %v232_v15  ;;  %v240_v5 = vsub.f32 %v2576_v52, %v239_v16  ;;  %v247_v10 = vsub.f32 %v2580_v54, %v246_v17 }
  0x4d   :  { %2061 = vmatprep.subr.bf16.mxu0 %v2453_v0  ;;  %v2074_v56 = vpack.c.bf16 %v206_v47, %v199_v41  ;;  %v213_v57 = vand.u32 4294901760, %v212_v48  ;;  %v220_v6 = vand.u32 4294901760, %v219_v49  ;;  %v254_v15 = vsub.f32 %v2587_v58, %v253_v19 }
  0x4e   :  { %v227_v8 = vand.u32 4294901760, %v226_v53  ;;  %v234_v9 = vand.u32 4294901760, %v233_v14  ;;  %v241_v11 = vand.u32 4294901760, %v240_v5  ;;  %v261_v41 = vsub.f32 %v2589_v59, %v260_v20  ;;  %v734_v5 = vld [vmem:[#allocation8 + $0x10] sm:$0xff] }
  0x4f   :  { %v2077_v7 = vpack.c.bf16 %v220_v6, %v213_v57  ;;  %v268_v16 = vsub.f32 %v2591_v60, %v267_v21  ;;  %v255_v47 = vand.u32 4294901760, %v254_v15  ;;  %v275_v17 = vsub.f32 %v2596_v63, %v274_v22 }
  0x50   :  { %2063 = vmatpush3.bf16.msra.mxu0 %v2582_v55  ;;  %v2080_v30 = vpack.c.bf16 %v234_v9, %v227_v8  ;;  %v262_v48 = vand.u32 4294901760, %v261_v41  ;;  %v282_v19 = vsub.f32 %v2600_v3, %v281_v23  ;;  %v289_v20 = vsub.f32 %v2602_v4, %v288_v27  ;;  %v732_v23 = vld [vmem:[#allocation8] sm:$0xff]  ;;  %v733_v27 = vld [vmem:[#allocation8 + $0x8] sm:$0xff]  ;;  %v738_v41 = vld [vmem:[#allocation8 + $0x30] sm:$0xff] }
  0x51   :  { %2064 = vmatprep.subr.bf16.mxu0 %v2453_v0  ;;  %v269_v49 = vand.u32 4294901760, %v268_v16  ;;  %v2095_v14 = vpack.c.bf16 %v2547_v25, %v2545_v24  ;;  %v749_v8 = vand.u32 4294901760, %v732_v23  ;;  %v752_v9 = vand.u32 4294901760, %v733_v27  ;;  %v737_v24 = vld [vmem:[#allocation8 + $0x28] sm:$0xff]  ;;  %v739_v16 = vld [vmem:[#allocation8 + $0x38] sm:$0xff] }
  0x52   :  { %v2086_v53 = vpack.c.bf16 %v262_v48, %v255_v47  ;;  %v283_v57 = vand.u32 4294901760, %v282_v19  ;;  %v290_v6 = vand.u32 4294901760, %v289_v20  ;;  %v764_v15 = vand.u32 4294901760, %v737_v24 }
  0x53   :  { %v2674_v47 = vpack.c.bf16 %v752_v9, %v749_v8 }
  0x54   :  { %2066 = vmatpush3.bf16.msra.mxu0 %v2594_v62  ;;  %v2092_v22 = vpack.c.bf16 %v290_v6, %v283_v57  ;;  %v2691_v20 = vsub.f32 %v737_v24, %v764_v15  ;;  %v770_v57 = vand.u32 4294901760, %v739_v16 }
  0x55   :  { %2067 = vmatprep.subr.bf16.mxu0 %v2453_v0  ;;  %2192 = vmatpush3.bf16.msra.mxu1 %v2674_v47 }
  0x56   :  { %2193 = vmatprep.subr.bf16.mxu1 %v2453_v0 }
  0x58   :  { %2069 = vmatpush3.bf16.msra.mxu0 %v2598_v2 }
  0x59   :  { %2070 = vmatprep.subr.bf16.mxu0 %v2453_v0 }
  0x5b   :  { %1659 = vmatmul.mubr.f32.vlgmr.msra.gmra.mrb[0].mxu0 %v174_v40  ;;  %v248_v40 = vand.u32 4294901760, %v247_v10  ;;  %v735_v10 = vld [vmem:[#allocation8 + $0x18] sm:$0xff] }
  0x5c   :  { %2072 = vmatpush3.bf16.msra.mxu0 %v2071_v46  ;;  %1693 = vmatprep.mubr.msk.f32.mxu0 %vm2454_vm0, %v2455_v1  ;;  %v758_v25 = vand.u32 4294901760, %v735_v10 }
  0x5d   :  { %2073 = vmatprep.subr.bf16.mxu0 %v2453_v0  ;;  %v2083_v46 = vpack.c.bf16 %v248_v40, %v241_v11  ;;  %v755_v11 = vand.u32 4294901760, %v734_v5 }
  0x5f   :  { %v2680_v48 = vsub.f32 %v734_v5, %v755_v11 }
  0x60   :  { %2075 = vmatpush3.bf16.msra.mxu0 %v2074_v56  ;;  %v276_v56 = vand.u32 4294901760, %v275_v17  ;;  %v741_v17 = vld [vmem:[#allocation8 + $0x48] sm:$0xff] }
  0x61   :  { %2076 = vmatprep.subr.bf16.mxu0 %v2453_v0 }
  0x62   :  { %v2089_v21 = vpack.c.bf16 %v276_v56, %v269_v49  ;;  %v2101_v49 = vpack.c.bf16 %v2566_v44, %v2564_v43  ;;  %v2686_v56 = vsub.f32 %v735_v10, %v758_v25  ;;  %v2697_v44 = vsub.f32 %v739_v16, %v770_v57 }
  0x63   :  { %v856_v10 = vand.u32 4294901760, %v2680_v48 }
  0x64   :  { %2078 = vmatpush3.bf16.msra.mxu0 %v2077_v7  ;;  %v2098_v7 = vpack.c.bf16 %v2562_v42, %v2555_v33  ;;  %v2676_v33 = vsub.f32 %v732_v23, %v749_v8  ;;  %v2678_v42 = vsub.f32 %v733_v27, %v752_v9  ;;  %v2104_v27 = vpack.c.bf16 %v2574_v51, %v2572_v50 }
  0x65   :  { %2079 = vmatprep.subr.bf16.mxu0 %v2453_v0  ;;  %v2110_v50 = vpack.c.bf16 %v2589_v59, %v2587_v58  ;;  %v745_v58 = vld [vmem:[#allocation8 + $0x68] sm:$0xff]  ;;  %v857_v24 = vsub.f32 %v2680_v48, %v856_v10 }
  0x66   :  { %v788_v59 = vand.u32 4294901760, %v745_v58 }
  0x68   :  { %2081 = vmatpush3.bf16.msra.mxu0 %v2080_v30  ;;  %v736_v30 = vld [vmem:[#allocation8 + $0x20] sm:$0xff] }
  0x69   :  { %2082 = vmatprep.subr.bf16.mxu0 %v2453_v0  ;;  %v761_v40 = vand.u32 4294901760, %v736_v30 }
  0x6b   :  { %v2688_v19 = vsub.f32 %v736_v30, %v761_v40  ;;  %v2706_v5 = vpack.c.bf16 %v764_v15, %v761_v40  ;;  %v858_v15 = vand.u32 4294901760, %v857_v24 }
  0x6c   :  { %2084 = vmatpush3.bf16.msra.mxu0 %v2083_v46  ;;  %v740_v46 = vld [vmem:[#allocation8 + $0x40] sm:$0xff] }
  0x6d   :  { %2085 = vmatprep.subr.bf16.mxu0 %v2453_v0  ;;  %v773_v6 = vand.u32 4294901760, %v740_v46  ;;  %v870_v16 = vand.u32 4294901760, %v2688_v19 }
  0x70   :  { %2087 = vmatpush3.bf16.msra.mxu0 %v2086_v53  ;;  %v2684_v53 = vpack.c.bf16 %v758_v25, %v755_v11  ;;  %v863_v11 = vand.u32 4294901760, %v2686_v56 }
  0x71   :  { %2088 = vmatprep.subr.bf16.mxu0 %v2453_v0 }
  0x72   :  { %2195 = vmatpush3.bf16.msra.mxu1 %v2684_v53  ;;  %v864_v25 = vsub.f32 %v2686_v56, %v863_v11 }
  0x73   :  { %2196 = vmatprep.subr.bf16.mxu1 %v2453_v0 }
  0x74   :  { %2090 = vmatpush3.bf16.msra.mxu0 %v2089_v21  ;;  %v767_v21 = vand.u32 4294901760, %v738_v41 }
  0x75   :  { %2091 = vmatprep.subr.bf16.mxu0 %v2453_v0 }
  0x76   :  { %v2695_v43 = vsub.f32 %v738_v41, %v767_v21  ;;  %2198 = vmatpush3.bf16.msra.mxu1 %v2706_v5  ;;  %v2713_v8 = vpack.c.bf16 %v770_v57, %v767_v21  ;;  %v865_v41 = vand.u32 4294901760, %v864_v25 }
  0x77   :  { %2199 = vmatprep.subr.bf16.mxu1 %v2453_v0 }
  0x78   :  { %2093 = vmatpush3.bf16.msra.mxu0 %v2092_v22  ;;  %v776_v22 = vand.u32 4294901760, %v741_v17 }
  0x79   :  { %2094 = vmatprep.subr.bf16.mxu0 %v2453_v0 }
  0x7a   :  { %v2701_v23 = vsub.f32 %v741_v17, %v776_v22  ;;  %2201 = vmatpush3.bf16.msra.mxu1 %v2713_v8  ;;  %v2720_v51 = vpack.c.bf16 %v776_v22, %v773_v6  ;;  %v2218_v17 = vpack.c.bf16 %v865_v41, %v858_v15  ;;  %v884_v22 = vand.u32 4294901760, %v2695_v43 }
  0x7b   :  { %1694 = vmatmul.mubr.f32.vlgmr.msra.gmra.mrb[0].mxu0 %v2553_v31  ;;  %2202 = vmatprep.subr.bf16.mxu1 %v2453_v0 }
  0x7c   :  { %2096 = vmatpush3.bf16.msra.mxu0 %v2095_v14  ;;  %1728 = vmatprep.mubr.msk.f32.mxu0 %vm2454_vm0, %v2455_v1  ;;  %v2699_v14 = vsub.f32 %v740_v46, %v773_v6  ;;  %v877_v46 = vand.u32 4294901760, %v2691_v20 }
  0x7d   :  { %2097 = vmatprep.subr.bf16.mxu0 %v2453_v0 }
  0x7e   :  { %2204 = vmatpush3.bf16.msra.mxu1 %v2720_v51  ;;  %v878_v21 = vsub.f32 %v2691_v20, %v877_v46 }
  0x7f   :  { %2205 = vmatprep.subr.bf16.mxu1 %v2453_v0 }
  0x80   :  { %2099 = vmatpush3.bf16.msra.mxu0 %v2098_v7  ;;  %v2107_v7 = vpack.c.bf16 %v2580_v54, %v2576_v52  ;;  %v2113_v52 = vpack.c.bf16 %v2596_v63, %v2591_v60  ;;  %v2116_v54 = vpack.c.bf16 %v2602_v4, %v2600_v3  ;;  %v2804_v3 = vsub.f32 %v745_v58, %v788_v59 }
  0x81   :  { %2100 = vmatprep.subr.bf16.mxu0 %v2453_v0  ;;  %v879_v6 = vand.u32 4294901760, %v878_v21 }
  0x82   :  { %v3027_v24 = vand.u32 4294901760, %v2804_v3 }
  0x84   :  { %2102 = vmatpush3.bf16.msra.mxu0 %v2101_v49  ;;  %v871_v49 = vsub.f32 %v2688_v19, %v870_v16  ;;  %v934_v41 = vsub.f32 %v2804_v3, %v3027_v24 }
  0x85   :  { %2103 = vmatprep.subr.bf16.mxu0 %v2453_v0 }
  0x86   :  { %v872_v57 = vand.u32 4294901760, %v871_v49  ;;  %v935_v21 = vand.u32 4294901760, %v934_v41 }
  0x88   :  { %2105 = vmatpush3.bf16.msra.mxu0 %v2104_v27  ;;  %v891_v27 = vand.u32 4294901760, %v2697_v44 }
  0x89   :  { %2106 = vmatprep.subr.bf16.mxu0 %v2453_v0 }
  0x8c   :  { %2108 = vmatpush3.bf16.msra.mxu0 %v2107_v7  ;;  %v2221_v7 = vpack.c.bf16 %v879_v6, %v872_v57 }
  0x8d   :  { %2109 = vmatprep.subr.bf16.mxu0 %v2453_v0 }
  0x90   :  { %2111 = vmatpush3.bf16.msra.mxu0 %v2110_v50  ;;  %v885_v50 = vsub.f32 %v2695_v43, %v884_v22 }
  0x91   :  { %2112 = vmatprep.subr.bf16.mxu0 %v2453_v0 }
  0x94   :  { %2114 = vmatpush3.bf16.msra.mxu0 %v2113_v52  ;;  %v892_v52 = vsub.f32 %v2697_v44, %v891_v27 }
  0x95   :  { %2115 = vmatprep.subr.bf16.mxu0 %v2453_v0 }
  0x98   :  { %2117 = vmatpush3.bf16.msra.mxu0 %v2116_v54  ;;  %v886_v54 = vand.u32 4294901760, %v885_v50 }
  0x99   :  { %2118 = vmatprep.subr.bf16.mxu0 %v2453_v0 }
  0x9b   :  { %1729 = vmatmul.mubr.f32.vlgmr.msra.gmra.mrb[0].mxu0 %v2570_v45 }
  0x9c   :  { %2120 = vmatpush3.bf16.msra.mxu0 %v2535_v12  ;;  %1763 = vmatprep.mubr.msk.f32.mxu0 %vm2454_vm0, %v2455_v1 }
  0x9d   :  { %2121 = vmatprep.subr.bf16.mxu0 %v2453_v0 }
  0xa0   :  { %2123 = vmatpush3.bf16.msra.mxu0 %v2538_v13 }
  0xa1   :  { %2124 = vmatprep.subr.bf16.mxu0 %v2453_v0 }
  0xa4   :  { %2126 = vmatpush3.bf16.msra.mxu0 %v2542_v18 }
  0xa5   :  { %2127 = vmatprep.subr.bf16.mxu0 %v2453_v0 }
  0xa8   :  { %2129 = vmatpush3.bf16.msra.mxu0 %v2550_v26 }
  0xa9   :  { %2130 = vmatprep.subr.bf16.mxu0 %v2453_v0 }
  0xac   :  { %2132 = vmatpush3.bf16.msra.mxu0 %v2558_v38 }
  0xad   :  { %2133 = vmatprep.subr.bf16.mxu0 %v2453_v0 }
  0xb0   :  { %2135 = vmatpush3.bf16.msra.mxu0 %v2582_v55 }
  0xb1   :  { %2136 = vmatprep.subr.bf16.mxu0 %v2453_v0 }
  0xb4   :  { %2138 = vmatpush3.bf16.msra.mxu0 %v2594_v62 }
  0xb5   :  { %2139 = vmatprep.subr.bf16.mxu0 %v2453_v0 }
  0xb8   :  { %2141 = vmatpush3.bf16.msra.mxu0 %v2598_v2 }
  0xb9   :  { %2142 = vmatprep.subr.bf16.mxu0 %v2453_v0 }
  0xbb   :  { %1764 = vmatmul.mubr.f32.vlgmr.msra.gmra.mrb[0].mxu0 %v172_v61  ;;  %v746_v61 = vld [vmem:[#allocation8 + $0x70] sm:$0xff] }
  0xbc   :  { %2144 = vmatpush3.bf16.msra.mxu0 %v2623_v28  ;;  %1798 = vmatprep.mubr.msk.f32.mxu0 %vm2454_vm0, %v2455_v1  ;;  %v791_v4 = vand.u32 4294901760, %v746_v61 }
  0xbd   :  { %2145 = vmatprep.subr.bf16.mxu0 %v2453_v0 }
  0xc0   :  { %2147 = vmatpush3.bf16.msra.mxu0 %v2625_v29  ;;  %v842_v29 = vand.u32 4294901760, %v2676_v33 }
  0xc1   :  { %2148 = vmatprep.subr.bf16.mxu0 %v2453_v0 }
  0xc4   :  { %2150 = vmatpush3.bf16.msra.mxu0 %v2629_v32  ;;  %v849_v32 = vand.u32 4294901760, %v2678_v42 }
  0xc5   :  { %2151 = vmatprep.subr.bf16.mxu0 %v2453_v0 }
  0xc8   :  { %2153 = vmatpush3.bf16.msra.mxu0 %v2631_v34 }
  0xc9   :  { %2154 = vmatprep.subr.bf16.mxu0 %v2453_v0 }
  0xcc   :  { %2156 = vmatpush3.bf16.msra.mxu0 %v2633_v35  ;;  %v2811_v35 = vsub.f32 %v746_v61, %v791_v4 }
  0xcd   :  { %2157 = vmatprep.subr.bf16.mxu0 %v2453_v0 }
  0xce   :  { %v3026_v57 = vand.u32 4294901760, %v2811_v35 }
  0xd0   :  { %2159 = vmatpush3.bf16.msra.mxu0 %v2636_v36 }
  0xd1   :  { %2160 = vmatprep.subr.bf16.mxu0 %v2453_v0 }
  0xd4   :  { %2162 = vmatpush3.bf16.msra.mxu0 %v2638_v37  ;;  %v843_v37 = vsub.f32 %v2676_v33, %v842_v29 }
  0xd5   :  { %2163 = vmatprep.subr.bf16.mxu0 %v2453_v0 }
  0xd6   :  { %v844_v9 = vand.u32 4294901760, %v843_v37 }
  0xd8   :  { %2165 = vmatpush3.bf16.msra.mxu0 %v2640_v39  ;;  %v850_v39 = vsub.f32 %v2678_v42, %v849_v32 }
  0xd9   :  { %2166 = vmatprep.subr.bf16.mxu0 %v2453_v0 }
  0xda   :  { %v851_v30 = vand.u32 4294901760, %v850_v39 }
  0xdb   :  { %1799 = vmatmul.mubr.f32.vlgmr.msra.gmra.mrb[0].mxu0 %v2553_v31 }
  0xdc   :  { %2168 = vmatpush3.bf16.msra.mxu0 %v2535_v12  ;;  %1833 = vmatprep.mubr.msk.f32.mxu0 %vm2454_vm0, %v2455_v1  ;;  %v742_v12 = vld [vmem:[#allocation8 + $0x50] sm:$0xff]  ;;  %v2831_v40 = vpack.c.bf16 %v851_v30, %v844_v9 }
  0xdd   :  { %2169 = vmatprep.subr.bf16.mxu0 %v2453_v0 }
  0xe0   :  { %2171 = vmatpush3.bf16.msra.mxu0 %v2538_v13  ;;  %v743_v13 = vld [vmem:[#allocation8 + $0x58] sm:$0xff] }
  0xe1   :  { %2172 = vmatprep.subr.bf16.mxu0 %v2453_v0 }
  0xe4   :  { %2174 = vmatpush3.bf16.msra.mxu0 %v2542_v18  ;;  %v779_v18 = vand.u32 4294901760, %v742_v12 }
  0xe5   :  { %2175 = vmatprep.subr.bf16.mxu0 %v2453_v0 }
  0xe6   :  { %v2797_v63 = vsub.f32 %v742_v12, %v779_v18  ;;  %v893_v12 = vand.u32 4294901760, %v892_v52  ;;  %v941_v52 = vsub.f32 %v2811_v35, %v3026_v57 }
  0xe8   :  { %2177 = vmatpush3.bf16.msra.mxu0 %v2550_v26  ;;  %v782_v26 = vand.u32 4294901760, %v743_v13  ;;  %v912_v61 = vand.u32 4294901760, %v2797_v63 }
  0xe9   :  { %2178 = vmatprep.subr.bf16.mxu0 %v2453_v0 }
  0xea   :  { %v2791_v45 = vpack.c.bf16 %v782_v26, %v779_v18  ;;  %v905_v18 = vand.u32 4294901760, %v2701_v23 }
  0xec   :  { %2180 = vmatpush3.bf16.msra.mxu0 %v2558_v38  ;;  %v744_v38 = vld [vmem:[#allocation8 + $0x60] sm:$0xff]  ;;  %2207 = vmatpush3.bf16.msra.mxu1 %v2791_v45  ;;  %v906_v58 = vsub.f32 %v2701_v23, %v905_v18 }
  0xed   :  { %2181 = vmatprep.subr.bf16.mxu0 %v2453_v0  ;;  %2208 = vmatprep.subr.bf16.mxu1 %v2453_v0 }
  0xf0   :  { %2183 = vmatpush3.bf16.msra.mxu0 %v2582_v55  ;;  %v785_v55 = vand.u32 4294901760, %v744_v38 }
  0xf1   :  { %2184 = vmatprep.subr.bf16.mxu0 %v2453_v0 }
  0xf2   :  { %v2795_v60 = vpack.c.bf16 %v788_v59, %v785_v55  ;;  %v907_v59 = vand.u32 4294901760, %v906_v58 }
  0xf4   :  { %2186 = vmatpush3.bf16.msra.mxu0 %v2594_v62  ;;  %v747_v62 = vld [vmem:[#allocation8 + $0x78] sm:$0xff]  ;;  %2210 = vmatpush3.bf16.msra.mxu1 %v2795_v60 }
  0xf5   :  { %2187 = vmatprep.subr.bf16.mxu0 %v2453_v0  ;;  %2211 = vmatprep.subr.bf16.mxu1 %v2453_v0  ;;  %v794_v28 = vand.u32 4294901760, %v747_v62 }
  0xf7   :  { %v2809_v34 = vpack.c.bf16 %v794_v28, %v791_v4  ;;  %v2813_v36 = vsub.f32 %v747_v62, %v794_v28  ;;  %v913_v28 = vsub.f32 %v2797_v63, %v912_v61 }
  0xf8   :  { %2189 = vmatpush3.bf16.msra.mxu0 %v2598_v2  ;;  %v2802_v2 = vsub.f32 %v744_v38, %v785_v55 }
  0xf9   :  { %2213 = vmatpush3.bf16.msra.mxu1 %v2809_v34  ;;  %v914_v39 = vand.u32 4294901760, %v913_v28  ;;  %v3025_v6 = vand.u32 4294901760, %v2813_v36  ;;  %v2245_v28 = vpack.c.bf16 %v2691_v20, %v2688_v19  ;;  %v2260_v41 = vpack.c.bf16 %v2813_v36, %v2811_v35 }
  0xfa   :  { %2214 = vmatprep.subr.bf16.mxu1 %v2453_v0  ;;  %v3028_v30 = vand.u32 4294901760, %v2802_v2  ;;  %v3029_v19 = vand.u32 4294901760, %v2802_v2  ;;  %v3030_v20 = vand.u32 4294901760, %v2804_v3 }
  0xfb   :  { %1834 = vmatmul.mubr.f32.vlgmr.msra.gmra.mrb[0].mxu0 %v2553_v31  ;;  %v2799_v31 = vsub.f32 %v743_v13, %v782_v26  ;;  %v898_v13 = vand.u32 4294901760, %v2699_v14  ;;  %v2224_v26 = vpack.c.bf16 %v893_v12, %v886_v54  ;;  %v948_v54 = vsub.f32 %v2813_v36, %v3025_v6 }
  0xfc   :  { %v927_v15 = vsub.f32 %v2802_v2, %v3028_v30  ;;  %v942_v12 = vand.u32 4294901760, %v941_v52 }
  0xfd   :  { %v899_v38 = vsub.f32 %v2699_v14, %v898_v13  ;;  %v919_v62 = vand.u32 4294901760, %v2799_v31 }
  0xfe   :  { %v928_v49 = vand.u32 4294901760, %v927_v15  ;;  %v2257_v15 = vpack.c.bf16 %v2804_v3, %v2802_v2 }
  0xff   :  { %v900_v55 = vand.u32 4294901760, %v899_v38  ;;  %v920_v37 = vsub.f32 %v2799_v31, %v919_v62  ;;  %v949_v38 = vand.u32 4294901760, %v948_v54 }
 0x100   :  { %v2233_v50 = vpack.c.bf16 %v935_v21, %v928_v49  ;;  %v1420_v49 = vld [vmem:[%s3021_s2] ss:$0 sm:$0xff] }
 0x101   :  { %v2227_v4 = vpack.c.bf16 %v907_v59, %v900_v55  ;;  %v921_v9 = vand.u32 4294901760, %v920_v37  ;;  %v2236_v58 = vpack.c.bf16 %v949_v38, %v942_v12  ;;  %v2239_v55 = vpack.c.bf16 %v2678_v42, %v2676_v33 }
 0x102   :  { %v2242_v59 = vpack.c.bf16 %v2686_v56, %v2680_v48  ;;  %v2248_v37 = vpack.c.bf16 %v2697_v44, %v2695_v43  ;;  %v2293_v33 = vpack.c.bf16 %v877_v46, %v870_v16  ;;  %v2296_v42 = vpack.c.bf16 %v891_v27, %v884_v22 }
 0x103   :  { %v2230_v25 = vpack.c.bf16 %v921_v9, %v914_v39  ;;  %v2251_v39 = vpack.c.bf16 %v2701_v23, %v2699_v14  ;;  %v2254_v9 = vpack.c.bf16 %v2799_v31, %v2797_v63  ;;  %v2299_v48 = vpack.c.bf16 %v905_v18, %v898_v13 }
 0x104   :  { %v2302_v56 = vpack.c.bf16 %v919_v62, %v912_v61  ;;  %v2305_v43 = vpack.c.bf16 %v3030_v20, %v3029_v19  ;;  %v3031_v44 = vand.u32 4294901760, %v2811_v35  ;;  %v3032_v14 = vand.u32 4294901760, %v2813_v36 }
 0x106   :  { %v2308_v23 = vpack.c.bf16 %v3032_v14, %v3031_v44 }
 0x1ce   :  { %v726_v21 = vpop.f32.mrb[0].mxu0 }
 0x1cf   :  { %v2334_v52 = vadd.f32 %v1420_v49, %v726_v21  ;;  %v1835_v54 = vpop.f32.mrb[1].mxu0 }
 0x1d1   :  { %v730_v12 = vmax.f32 %v2334_v52, 0.0 }
 0x1d3   :  { %v2900_v38 = vand.u32 4294901760, %v730_v12 }
 0x1d5   :  { %v830_v6 = vsub.f32 %v730_v12, %v2900_v38 }
 0x1d7   :  { %v831_v57 = vand.u32 4294901760, %v830_v6 }
 0x1d9   :  { %v832_v24 = vsub.f32 %v830_v6, %v831_v57 }
 0x1db   :  { %v833_v30 = vand.u32 4294901760, %v832_v24 }
 0x1dd   :  { %1869 = vmatmul.mubr.f32.vlgmr.msra.gmra.mrb[0].mxu1 %v833_v30 }
 0x1de   :  { %2216 = vmatpush3.bf16.msra.mxu1 %v2831_v40  ;;  %1903 = vmatprep.mubr.msk.f32.mxu1 %vm2454_vm0, %v2455_v1  ;;  %v2287_v40 = vpack.c.bf16 %v849_v32, %v842_v29 }
 0x1df   :  { %2217 = vmatprep.subr.bf16.mxu1 %v2453_v0 }
 0x1e2   :  { %2219 = vmatpush3.bf16.msra.mxu1 %v2218_v17  ;;  %v2290_v17 = vpack.c.bf16 %v863_v11, %v856_v10 }
 0x1e3   :  { %2220 = vmatprep.subr.bf16.mxu1 %v2453_v0 }
 0x1e6   :  { %2222 = vmatpush3.bf16.msra.mxu1 %v2221_v7 }
 0x1e7   :  { %2223 = vmatprep.subr.bf16.mxu1 %v2453_v0 }
 0x1ea   :  { %2225 = vmatpush3.bf16.msra.mxu1 %v2224_v26 }
 0x1eb   :  { %2226 = vmatprep.subr.bf16.mxu1 %v2453_v0 }
 0x1ee   :  { %2228 = vmatpush3.bf16.msra.mxu1 %v2227_v4 }
 0x1ef   :  { %2229 = vmatprep.subr.bf16.mxu1 %v2453_v0 }
 0x1f2   :  { %2231 = vmatpush3.bf16.msra.mxu1 %v2230_v25 }
 0x1f3   :  { %2232 = vmatprep.subr.bf16.mxu1 %v2453_v0 }
 0x1f6   :  { %2234 = vmatpush3.bf16.msra.mxu1 %v2233_v50 }
 0x1f7   :  { %2235 = vmatprep.subr.bf16.mxu1 %v2453_v0 }
 0x1fa   :  { %2237 = vmatpush3.bf16.msra.mxu1 %v2236_v58 }
 0x1fb   :  { %2238 = vmatprep.subr.bf16.mxu1 %v2453_v0 }
 0x1fd   :  { %1904 = vmatmul.mubr.f32.vlgmr.msra.gmra.mrb[2].mxu1 %v2900_v38 }
 0x1fe   :  { %2240 = vmatpush3.bf16.msra.mxu1 %v2239_v55  ;;  %1938 = vmatprep.mubr.msk.f32.mxu1 %vm2454_vm0, %v2455_v1 }
 0x1ff   :  { %2241 = vmatprep.subr.bf16.mxu1 %v2453_v0 }
 0x202   :  { %2243 = vmatpush3.bf16.msra.mxu1 %v2242_v59 }
 0x203   :  { %2244 = vmatprep.subr.bf16.mxu1 %v2453_v0 }
 0x206   :  { %2246 = vmatpush3.bf16.msra.mxu1 %v2245_v28 }
 0x207   :  { %2247 = vmatprep.subr.bf16.mxu1 %v2453_v0 }
 0x20a   :  { %2249 = vmatpush3.bf16.msra.mxu1 %v2248_v37 }
 0x20b   :  { %2250 = vmatprep.subr.bf16.mxu1 %v2453_v0 }
 0x20e   :  { %2252 = vmatpush3.bf16.msra.mxu1 %v2251_v39 }
 0x20f   :  { %2253 = vmatprep.subr.bf16.mxu1 %v2453_v0 }
 0x212   :  { %2255 = vmatpush3.bf16.msra.mxu1 %v2254_v9 }
 0x213   :  { %2256 = vmatprep.subr.bf16.mxu1 %v2453_v0 }
 0x216   :  { %2258 = vmatpush3.bf16.msra.mxu1 %v2257_v15 }
 0x217   :  { %2259 = vmatprep.subr.bf16.mxu1 %v2453_v0 }
 0x21a   :  { %2261 = vmatpush3.bf16.msra.mxu1 %v2260_v41 }
 0x21b   :  { %2262 = vmatprep.subr.bf16.mxu1 %v2453_v0 }
 0x21d   :  { %1939 = vmatmul.mubr.f32.vlgmr.msra.gmra.mrb[4].mxu1 %v830_v6 }
 0x21e   :  { %2264 = vmatpush3.bf16.msra.mxu1 %v2674_v47  ;;  %1973 = vmatprep.mubr.msk.f32.mxu1 %vm2454_vm0, %v2455_v1 }
 0x21f   :  { %2265 = vmatprep.subr.bf16.mxu1 %v2453_v0 }
 0x222   :  { %2267 = vmatpush3.bf16.msra.mxu1 %v2684_v53 }
 0x223   :  { %2268 = vmatprep.subr.bf16.mxu1 %v2453_v0 }
 0x226   :  { %2270 = vmatpush3.bf16.msra.mxu1 %v2706_v5 }
 0x227   :  { %2271 = vmatprep.subr.bf16.mxu1 %v2453_v0 }
 0x22a   :  { %2273 = vmatpush3.bf16.msra.mxu1 %v2713_v8 }
 0x22b   :  { %2274 = vmatprep.subr.bf16.mxu1 %v2453_v0 }
 0x22e   :  { %2276 = vmatpush3.bf16.msra.mxu1 %v2720_v51 }
 0x22f   :  { %2277 = vmatprep.subr.bf16.mxu1 %v2453_v0 }
 0x232   :  { %2279 = vmatpush3.bf16.msra.mxu1 %v2791_v45 }
 0x233   :  { %2280 = vmatprep.subr.bf16.mxu1 %v2453_v0 }
 0x236   :  { %2282 = vmatpush3.bf16.msra.mxu1 %v2795_v60 }
 0x237   :  { %2283 = vmatprep.subr.bf16.mxu1 %v2453_v0 }
 0x23a   :  { %2285 = vmatpush3.bf16.msra.mxu1 %v2809_v34 }
 0x23b   :  { %2286 = vmatprep.subr.bf16.mxu1 %v2453_v0 }
 0x23d   :  { %1974 = vmatmul.mubr.f32.vlgmr.msra.gmra.mrb[6].mxu1 %v831_v57 }
 0x23e   :  { %2288 = vmatpush3.bf16.msra.mxu1 %v2287_v40  ;;  %2008 = vmatprep.mubr.msk.f32.mxu1 %vm2454_vm0, %v2455_v1 }
 0x23f   :  { %2289 = vmatprep.subr.bf16.mxu1 %v2453_v0 }
 0x242   :  { %2291 = vmatpush3.bf16.msra.mxu1 %v2290_v17 }
 0x243   :  { %2292 = vmatprep.subr.bf16.mxu1 %v2453_v0 }
 0x246   :  { %2294 = vmatpush3.bf16.msra.mxu1 %v2293_v33 }
 0x247   :  { %2295 = vmatprep.subr.bf16.mxu1 %v2453_v0 }
 0x24a   :  { %2297 = vmatpush3.bf16.msra.mxu1 %v2296_v42 }
 0x24b   :  { %2298 = vmatprep.subr.bf16.mxu1 %v2453_v0 }
 0x24e   :  { %2300 = vmatpush3.bf16.msra.mxu1 %v2299_v48 }
 0x24f   :  { %2301 = vmatprep.subr.bf16.mxu1 %v2453_v0 }
 0x252   :  { %2303 = vmatpush3.bf16.msra.mxu1 %v2302_v56 }
 0x253   :  { %2304 = vmatprep.subr.bf16.mxu1 %v2453_v0 }
 0x256   :  { %2306 = vmatpush3.bf16.msra.mxu1 %v2305_v43 }
 0x257   :  { %2307 = vmatprep.subr.bf16.mxu1 %v2453_v0 }
 0x25a   :  { %2309 = vmatpush3.bf16.msra.mxu1 %v2308_v23 }
 0x25b   :  { %2310 = vmatprep.subr.bf16.mxu1 %v2453_v0 }
 0x25d   :  { %2009 = vmatmul.mubr.f32.vlgmr.msra.gmra.mrb[8].mxu1 %v2900_v38 }
 0x25e   :  { %2312 = vmatpush3.bf16.msra.mxu1 %v2674_v47  ;;  %2043 = vmatprep.mubr.msk.f32.mxu1 %vm2454_vm0, %v2455_v1 }
 0x25f   :  { %2313 = vmatprep.subr.bf16.mxu1 %v2453_v0 }
 0x262   :  { %2315 = vmatpush3.bf16.msra.mxu1 %v2684_v53 }
 0x263   :  { %2316 = vmatprep.subr.bf16.mxu1 %v2453_v0 }
 0x266   :  { %2318 = vmatpush3.bf16.msra.mxu1 %v2706_v5 }
 0x267   :  { %2319 = vmatprep.subr.bf16.mxu1 %v2453_v0 }
 0x26a   :  { %2321 = vmatpush3.bf16.msra.mxu1 %v2713_v8 }
 0x26b   :  { %2322 = vmatprep.subr.bf16.mxu1 %v2453_v0 }
 0x26e   :  { %2324 = vmatpush3.bf16.msra.mxu1 %v2720_v51 }
 0x26f   :  { %2325 = vmatprep.subr.bf16.mxu1 %v2453_v0 }
 0x272   :  { %2327 = vmatpush3.bf16.msra.mxu1 %v2791_v45 }
 0x273   :  { %2328 = vmatprep.subr.bf16.mxu1 %v2453_v0 }
 0x276   :  { %2330 = vmatpush3.bf16.msra.mxu1 %v2795_v60 }
 0x277   :  { %2331 = vmatprep.subr.bf16.mxu1 %v2453_v0  ;;  %v1421_v0 = vld [vmem:[%s3023_s4] ss:$0 sm:$0xff] }
 0x27a   :  { %2333 = vmatpush3.bf16.msra.mxu1 %v2809_v34 }
 0x27d   :  { %2044 = vmatmul.mubr.f32.vlgmr.msra.gmra.mrb[10].mxu1 %v2900_v38 }
 0x2b0   :  { %v835_v1 = vpop.f32.mrb[0].mxu1 }
 0x2b1   :  { %v1870_v47 = vpop.f32.mrb[1].mxu1 }
 0x2d0   :  { %v986_v53 = vpop.f32.mrb[2].mxu1 }
 0x2d1   :  { %v987_v5 = vadd.f32 %v986_v53, %v835_v1  ;;  %v1905_v8 = vpop.f32.mrb[3].mxu1 }
 0x2f0   :  { %v1090_v51 = vpop.f32.mrb[4].mxu1 }
 0x2f1   :  { %v1091_v63 = vadd.f32 %v1090_v51, %v987_v5  ;;  %v1940_v31 = vpop.f32.mrb[5].mxu1 }
 0x310   :  { %v1179_v2 = vpop.f32.mrb[6].mxu1 }
 0x311   :  { %v1180_v45 = vadd.f32 %v1179_v2, %v1091_v63  ;;  %v1975_v3 = vpop.f32.mrb[7].mxu1 }
 0x330   :  { %v1298_v29 = vpop.f32.mrb[8].mxu1 }
 0x331   :  { %v1299_v32 = vadd.f32 %v1298_v29, %v1180_v45  ;;  %v2010_v60 = vpop.f32.mrb[9].mxu1 }
 0x350   :  { %v1385_v35 = vpop.f32.mrb[10].mxu1 }
 0x351   :  { %v1386_v34 = vadd.f32 %v1385_v35, %v1299_v32  ;;  %v2045_v36 = vpop.f32.mrb[11].mxu1 }
 0x353   :  { %v1402_v10 = vadd.f32 %v1421_v0, %v1386_v34 }
 0x355   :  { %1403 = vst [vmem:[#allocation9] sm:$0xff] %v1402_v10 }
 0x356   :  { %2431 = shalt.err (!%p2428_p0)
}
 0x357   :  { %s2432_s11 = scalar_lea.hbm %s3024_s5, 128 }
 0x358   :  { %p2433_p1 = scmp.ne.s32.totalorder %s3024_s5, %s2432_s11  ;;  %p2436_p2 = scmp.lt.u32.totalorder %s2432_s11, %s3024_s5 }
 0x35a   :  { %p2438_p3 = pnand %p2436_p2, %p2433_p1 }
 0x35c   :  { %2441 = shalt.err (!%p2438_p3)
}
 0x35d   :  { %1413 = dma.vmem_to_hbm [thread:$0]  %s1411_s7, 128, %s3024_s5, [#allocation5]  }
 0x35e   :  { %2446 = dma.done.wait [#allocation5], 128  }
 0x35f   :  { %2447 = vsyncadd [#allocation5], 4294967168 }
 0x360   :  { %1417 = vsyncpa [#allocation4], 1 }
 0x361   :  { %1418 = vsyncpa [#allocation7], 1 }
 0x362   :  { %1419 = vsyncpa [#allocation5], 1 }

</bundles_post_ra>
